<compile_context>
chip_gen: v5e
topology: v5e:2x2
jax: 0.10.0
libtpu: 0.0.40
codegen_flags: <defaults>
</compile_context>

<pallas_src>
import math

import jax
import jax.numpy as jnp
from jax.experimental import pallas as pl
from jax.experimental.pallas import tpu as pltpu

_LANE = 128
_SUBLANE = 8
_VMEM_BUDGET = 20 * 1024 * 1024      # conservative tile budget (fits v7x)
_VMEM_LIMIT = 48 * 1024 * 1024       # explicit scoped-VMEM limit (< 64 MiB v7x)


def _round_up(n, m):
    return ((n + m - 1) // m) * m


def _pad_to(a, shape):
    pads = tuple((0, t - s) for s, t in zip(a.shape, shape))
    if all(p == (0, 0) for p in pads):
        return a
    return jnp.pad(a, pads)


def _output_head_kernel(x_ref, w1_ref, b1_ref, w2_ref, b2_ref, w3_ref, b3_ref,
                        o_ref):
    x = x_ref[...]

    # fc1 -> ReLU   (dropout = identity at inference)
    h1 = jnp.dot(x, w1_ref[...], preferred_element_type=jnp.float32) + b1_ref[...]
    h1 = jnp.maximum(h1, 0.0)

    # fc2 -> LeakyReLU(0.01)   (dropout = identity at inference)
    h2 = jnp.dot(h1, w2_ref[...], preferred_element_type=jnp.float32) + b2_ref[...]
    h2 = jnp.where(h2 > 0, h2, 0.01 * h2)

    # fc3 (output dim zero-padded to 128 lanes -> single full MXU tile,
    # lane-dense store)
    p = jnp.dot(h2, w3_ref[...], preferred_element_type=jnp.float32) + b3_ref[...]

    o_ref[...] = p.astype(o_ref.dtype)


def _choose_batch_tile(batch, din_p, h_p, h2_p, o_p):
    """Largest batch tile (multiple of 8, <= 1024) that fits the VMEM budget."""
    weight_bytes = 4 * (din_p * h_p + h_p * h2_p + h2_p * o_p + h_p + h2_p + o_p)
    # per-batch-row bytes: double-buffered x & out tiles + f32 intermediates
    per_row = 4 * (2 * din_p + 2 * o_p + h_p + h2_p)
    avail = max(_VMEM_BUDGET - weight_bytes, per_row * _SUBLANE)
    tb = (avail // per_row) // _SUBLANE * _SUBLANE
    tb = max(_SUBLANE, min(1024, int(tb)))
    return min(tb, _round_up(batch, _SUBLANE))


def output_head_forward(x, params, *, batch_tile=None):
    """Run the fused OutputHead kernel.

    x:      (batch, input_dim) float
    params: dict with w1 (Din,H), b1 (1,H), w2 (H,H//2), b2 (1,H//2),
            w3 (H//2,O), b3 (1,O)   (weights stored (in, out): y = x @ W + b)
    """
    batch, din = x.shape
    w1, b1 = params["w1"], params["b1"]
    w2, b2 = params["w2"], params["b2"]
    w3, b3 = params["w3"], params["b3"]
    hidden, h2_dim, out_dim = w1.shape[1], w2.shape[1], w3.shape[1]

    # --- 128-lane alignment (zero padding is exact for this MLP) ------------
    din_p = _round_up(din, _LANE)
    h_p = _round_up(hidden, _LANE)
    h2_p = _round_up(h2_dim, _LANE)
    o_p = _round_up(out_dim, _LANE)

    x_p = _pad_to(x.astype(jnp.float32), (batch, din_p))
    w1_p = _pad_to(w1, (din_p, h_p))
    b1_p = _pad_to(b1, (1, h_p))
    w2_p = _pad_to(w2, (h_p, h2_p))
    b2_p = _pad_to(b2, (1, h2_p))
    w3_p = _pad_to(w3, (h2_p, o_p))
    b3_p = _pad_to(b3, (1, o_p))

    # --- batch tiling --------------------------------------------------------
    tb = batch_tile if batch_tile is not None else _choose_batch_tile(
        batch, din_p, h_p, h2_p, o_p)
    tb = max(_SUBLANE, _round_up(int(tb), _SUBLANE))
    b_pad = _round_up(batch, tb)
    if b_pad != batch:
        x_p = jnp.pad(x_p, ((0, b_pad - batch), (0, 0)))
    grid = (b_pad // tb,)

    tiled = lambda i: (i, 0)        # x / out: block i along the batch axis
    resident = lambda i: (0, 0)     # weights/biases: single block, stays in VMEM

    flops = 2 * b_pad * (din_p * h_p + h_p * h2_p + h2_p * o_p)
    bytes_accessed = 4 * (b_pad * din_p + b_pad * o_p
                          + din_p * h_p + h_p * h2_p + h2_p * o_p
                          + h_p + h2_p + o_p)

    raw = pl.pallas_call(
        _output_head_kernel,
        out_shape=jax.ShapeDtypeStruct((b_pad, o_p), jnp.float32),
        grid=grid,
        in_specs=[
            pl.BlockSpec((tb, din_p), tiled),
            pl.BlockSpec((din_p, h_p), resident),
            pl.BlockSpec((1, h_p), resident),
            pl.BlockSpec((h_p, h2_p), resident),
            pl.BlockSpec((1, h2_p), resident),
            pl.BlockSpec((h2_p, o_p), resident),
            pl.BlockSpec((1, o_p), resident),
        ],
        out_specs=pl.BlockSpec((tb, o_p), tiled),
        compiler_params=pltpu.CompilerParams(
            dimension_semantics=("parallel",),
            vmem_limit_bytes=_VMEM_LIMIT,
        ),
        cost_estimate=pl.CostEstimate(
            flops=int(flops), transcendentals=0,
            bytes_accessed=int(bytes_accessed)),
    )(x_p, w1_p, b1_p, w2_p, b2_p, w3_p, b3_p)

    pred = raw[:batch, :out_dim]

    # Global (whole-tensor) NaN/Inf -> zeros fallback, then clamp, exactly as
    # in the torch module.  Done in XLA on the tiny sliced result so the
    # semantics stay global even though the kernel is batch-tiled.
    bad = jnp.any(jnp.isnan(pred) | jnp.isinf(pred))
    pred = jnp.where(bad, jnp.zeros_like(pred), pred)
    return jnp.clip(pred, -100.0, 100.0)


def init_output_head_params(key, input_dim, hidden_dim, output_dim=1):
    """Xavier-uniform weights, zero biases (matches _init_weights)."""
    k1, k2, k3 = jax.random.split(key, 3)

    def xavier(k, fan_in, fan_out):
        bound = math.sqrt(6.0 / (fan_in + fan_out))
        # stored as (in, out) so the kernel computes x @ W
        return jax.random.uniform(k, (fan_in, fan_out), jnp.float32,
                                  minval=-bound, maxval=bound)

    h2 = hidden_dim // 2
    return {
        "w1": xavier(k1, input_dim, hidden_dim),
        "b1": jnp.zeros((1, hidden_dim), jnp.float32),
        "w2": xavier(k2, hidden_dim, h2),
        "b2": jnp.zeros((1, h2), jnp.float32),
        "w3": xavier(k3, h2, output_dim),
        "b3": jnp.zeros((1, output_dim), jnp.float32),
    }


def _reference_forward(x, params):
    """Pure-JAX reference of the torch forward (eval mode)."""
    h1 = jnp.maximum(x @ params["w1"] + params["b1"], 0.0)
    h2 = h1 @ params["w2"] + params["b2"]
    h2 = jnp.where(h2 > 0, h2, 0.01 * h2)
    p = h2 @ params["w3"] + params["b3"]
    bad = jnp.any(jnp.isnan(p) | jnp.isinf(p))
    p = jnp.where(bad, jnp.zeros_like(p), p)
    return jnp.clip(p, -100.0, 100.0)


if __name__ == "__main__":
    key = jax.random.PRNGKey(0)
    k_param, k_x, k_param2, k_x2 = jax.random.split(key, 4)

    # --- case 1: small shapes matching the module ----------------------------
    batch, input_dim, hidden_dim, output_dim = 8, 32, 32, 1
    params = init_output_head_params(k_param, input_dim, hidden_dim, output_dim)
    x = jax.random.normal(k_x, (batch, input_dim), jnp.float32)

    out = jax.block_until_ready(output_head_forward(x, params))
    ref = _reference_forward(x, params)
    assert out.shape == (batch, output_dim)
    assert jnp.allclose(out, ref, atol=1e-5, rtol=1e-5)

    # --- case 2: multi-tile grid (grid > 1) with unaligned dims --------------
    b2_, d2_, h2_ = 40, 64, 96
    params2 = init_output_head_params(k_param2, d2_, h2_, output_dim)
    x2 = jax.random.normal(k_x2, (b2_, d2_), jnp.float32)
    out2 = jax.block_until_ready(output_head_forward(x2, params2, batch_tile=16))
    ref2 = _reference_forward(x2, params2)
    assert out2.shape == (b2_, output_dim)
    assert jnp.allclose(out2, ref2, atol=1e-4, rtol=1e-4)

    # --- case 3: NaN/Inf fallback path (global zeroing) ----------------------
    params_bad = dict(params)
    params_bad["b3"] = jnp.full_like(params["b3"], jnp.inf)
    out_bad = jax.block_until_ready(output_head_forward(x, params_bad))
    assert jnp.all(out_bad == 0.0)

    print("KERNEL_OK")
</pallas_src>

<mosaic_0001>
module attributes {stable_mosaic.version = 11 : i64} {
  func.func @_output_head_kernel(%arg0: i32, %arg1: memref<8x128xf32, #tpu.memory_space<vmem>>, %arg2: memref<128x128xf32, #tpu.memory_space<vmem>>, %arg3: memref<1x128xf32, #tpu.memory_space<vmem>>, %arg4: memref<128x128xf32, #tpu.memory_space<vmem>>, %arg5: memref<1x128xf32, #tpu.memory_space<vmem>>, %arg6: memref<128x128xf32, #tpu.memory_space<vmem>>, %arg7: memref<1x128xf32, #tpu.memory_space<vmem>>, %arg8: memref<8x128xf32, #tpu.memory_space<vmem>>) attributes {dimension_semantics = [#tpu.dimension_semantics<parallel>], iteration_bounds = array<i64: 1>, scalar_prefetch = 0 : i64, scratch_operands = 0 : i64, tpu.core_type = #tpu.core_type<tc>, window_params = [{transform_indices = @transform_0, window_bounds = array<i64: 8, 128>}, {pipeline_mode = #tpu.pipeline_mode<synchronous>, transform_indices = @transform_1, window_bounds = array<i64: 128, 128>}, {pipeline_mode = #tpu.pipeline_mode<synchronous>, transform_indices = @transform_2, window_bounds = array<i64: 1, 128>}, {pipeline_mode = #tpu.pipeline_mode<synchronous>, transform_indices = @transform_3, window_bounds = array<i64: 128, 128>}, {pipeline_mode = #tpu.pipeline_mode<synchronous>, transform_indices = @transform_4, window_bounds = array<i64: 1, 128>}, {pipeline_mode = #tpu.pipeline_mode<synchronous>, transform_indices = @transform_5, window_bounds = array<i64: 128, 128>}, {pipeline_mode = #tpu.pipeline_mode<synchronous>, transform_indices = @transform_6, window_bounds = array<i64: 1, 128>}, {transform_indices = @transform_7, window_bounds = array<i64: 8, 128>}]} {
    %c0 = arith.constant 0 : index
    %c0_0 = arith.constant 0 : index
    %0 = vector.load %arg1[%c0, %c0_0] : memref<8x128xf32, #tpu.memory_space<vmem>>, vector<8x128xf32>
    %c0_1 = arith.constant 0 : index
    %c0_2 = arith.constant 0 : index
    %1 = vector.load %arg2[%c0_1, %c0_2] : memref<128x128xf32, #tpu.memory_space<vmem>>, vector<128x128xf32>
    %cst = arith.constant dense<0.000000e+00> : vector<8x128xf32>
    %2 = tpu.matmul %0, %1, %cst {dimension_numbers = #tpu.dot_dimension_numbers<[1], [0], [0], [1], [0, 0, 1, 1], [], []>} : vector<8x128xf32>, vector<128x128xf32>, vector<8x128xf32> -> vector<8x128xf32>
    %c0_3 = arith.constant 0 : index
    %c0_4 = arith.constant 0 : index
    %3 = vector.load %arg3[%c0_3, %c0_4] : memref<1x128xf32, #tpu.memory_space<vmem>>, vector<1x128xf32>
    %4 = vector.broadcast %3 : vector<1x128xf32> to vector<8x128xf32>
    %5 = arith.addf %2, %4 : vector<8x128xf32>
    %cst_5 = arith.constant 0.000000e+00 : f32
    %6 = vector.broadcast %cst_5 : f32 to vector<8x128xf32>
    %7 = arith.maximumf %5, %6 : vector<8x128xf32>
    %c0_6 = arith.constant 0 : index
    %c0_7 = arith.constant 0 : index
    %8 = vector.load %arg4[%c0_6, %c0_7] : memref<128x128xf32, #tpu.memory_space<vmem>>, vector<128x128xf32>
    %cst_8 = arith.constant dense<0.000000e+00> : vector<8x128xf32>
    %9 = tpu.matmul %7, %8, %cst_8 {dimension_numbers = #tpu.dot_dimension_numbers<[1], [0], [0], [1], [0, 0, 1, 1], [], []>} : vector<8x128xf32>, vector<128x128xf32>, vector<8x128xf32> -> vector<8x128xf32>
    %c0_9 = arith.constant 0 : index
    %c0_10 = arith.constant 0 : index
    %10 = vector.load %arg5[%c0_9, %c0_10] : memref<1x128xf32, #tpu.memory_space<vmem>>, vector<1x128xf32>
    %11 = vector.broadcast %10 : vector<1x128xf32> to vector<8x128xf32>
    %12 = arith.addf %9, %11 : vector<8x128xf32>
    %cst_11 = arith.constant 0.000000e+00 : f32
    %13 = vector.broadcast %cst_11 : f32 to vector<8x128xf32>
    %14 = arith.cmpf ogt, %12, %13 : vector<8x128xf32>
    %cst_12 = arith.constant 0.00999999977 : f32
    %15 = vector.broadcast %cst_12 : f32 to vector<8x128xf32>
    %16 = arith.mulf %15, %12 : vector<8x128xf32>
    %17 = arith.select %14, %12, %16 : vector<8x128xi1>, vector<8x128xf32>
    %c0_13 = arith.constant 0 : index
    %c0_14 = arith.constant 0 : index
    %18 = vector.load %arg6[%c0_13, %c0_14] : memref<128x128xf32, #tpu.memory_space<vmem>>, vector<128x128xf32>
    %cst_15 = arith.constant dense<0.000000e+00> : vector<8x128xf32>
    %19 = tpu.matmul %17, %18, %cst_15 {dimension_numbers = #tpu.dot_dimension_numbers<[1], [0], [0], [1], [0, 0, 1, 1], [], []>} : vector<8x128xf32>, vector<128x128xf32>, vector<8x128xf32> -> vector<8x128xf32>
    %c0_16 = arith.constant 0 : index
    %c0_17 = arith.constant 0 : index
    %20 = vector.load %arg7[%c0_16, %c0_17] : memref<1x128xf32, #tpu.memory_space<vmem>>, vector<1x128xf32>
    %21 = vector.broadcast %20 : vector<1x128xf32> to vector<8x128xf32>
    %22 = arith.addf %19, %21 : vector<8x128xf32>
    %c0_18 = arith.constant 0 : index
    %c0_19 = arith.constant 0 : index
    %23 = vector.load %arg8[%c0_18, %c0_19] : memref<8x128xf32, #tpu.memory_space<vmem>>, vector<8x128xf32>
    tpu.vector_store %arg8[%c0_18, %c0_19], %22 {strides = array<i32>} : memref<8x128xf32, #tpu.memory_space<vmem>>, vector<8x128xf32>,
    return
  }
  func.func @transform_0(%arg0: i32) -> (i32, i32) {
    %c0_i32 = arith.constant 0 : i32
    %c0_i32_0 = arith.constant 0 : i32
    return %arg0, %c0_i32 : i32, i32
  }
  func.func @transform_1(%arg0: i32) -> (i32, i32) {
    %c0_i32 = arith.constant 0 : i32
    %c0_i32_0 = arith.constant 0 : i32
    %c0_i32_1 = arith.constant 0 : i32
    return %c0_i32, %c0_i32_0 : i32, i32
  }
  func.func @transform_2(%arg0: i32) -> (i32, i32) {
    %c0_i32 = arith.constant 0 : i32
    %c0_i32_0 = arith.constant 0 : i32
    %c0_i32_1 = arith.constant 0 : i32
    return %c0_i32, %c0_i32_0 : i32, i32
  }
  func.func @transform_3(%arg0: i32) -> (i32, i32) {
    %c0_i32 = arith.constant 0 : i32
    %c0_i32_0 = arith.constant 0 : i32
    %c0_i32_1 = arith.constant 0 : i32
    return %c0_i32, %c0_i32_0 : i32, i32
  }
  func.func @transform_4(%arg0: i32) -> (i32, i32) {
    %c0_i32 = arith.constant 0 : i32
    %c0_i32_0 = arith.constant 0 : i32
    %c0_i32_1 = arith.constant 0 : i32
    return %c0_i32, %c0_i32_0 : i32, i32
  }
  func.func @transform_5(%arg0: i32) -> (i32, i32) {
    %c0_i32 = arith.constant 0 : i32
    %c0_i32_0 = arith.constant 0 : i32
    %c0_i32_1 = arith.constant 0 : i32
    return %c0_i32, %c0_i32_0 : i32, i32
  }
  func.func @transform_6(%arg0: i32) -> (i32, i32) {
    %c0_i32 = arith.constant 0 : i32
    %c0_i32_0 = arith.constant 0 : i32
    %c0_i32_1 = arith.constant 0 : i32
    return %c0_i32, %c0_i32_0 : i32, i32
  }
  func.func @transform_7(%arg0: i32) -> (i32, i32) {
    %c0_i32 = arith.constant 0 : i32
    %c0_i32_0 = arith.constant 0 : i32
    return %arg0, %c0_i32 : i32, i32
  }
}

</mosaic_0001>

<bundles_post_ra>
// kernel: tpu_custom_call.1
= control target key start
LH: loop header
LB: loop body
LE: loop exit
PB: predicated region body
PF: predicated region fallthrough
CT: control target
= control target key end

     0   :  { %12 = vsyncpa [#allocation3], 0  ;;  %s442_s0 = inlined_call_operand.hbm [shape: f32[8,128], index: 0, kind: input, shape index: {}]   ;;  %s443_s1 = inlined_call_operand.hbm [shape: f32[128,128], index: 1, kind: input, shape index: {}]   ;;  %s444_s2 = inlined_call_operand.vmem [shape: f32[1,128], index: 2, kind: input, shape index: {}]   ;;  %s445_s3 = inlined_call_operand.hbm [shape: f32[128,128], index: 3, kind: input, shape index: {}]   ;;  %s446_s4 = inlined_call_operand.vmem [shape: f32[1,128], index: 4, kind: input, shape index: {}]   ;;  %s447_s5 = inlined_call_operand.hbm [shape: f32[128,128], index: 5, kind: input, shape index: {}]   ;;  %s448_s6 = inlined_call_operand.vmem [shape: f32[1,128], index: 6, kind: input, shape index: {}]   ;;  %s449_s7 = inlined_call_operand.hbm [shape: f32[8,128], index: 7, kind: output, shape index: {}]  }
   0x1   :  { %13 = vsyncpa [#allocation6], 0 }
   0x2   :  { %14 = vsyncpa [#allocation9], 0  ;;  %s31_s26 = sshll.u32 %s443_s1, 4  ;;  %s32_s26 = int_to_ptr.hbm [resolvable:$true] %s31_s26 }
   0x3   :  { %15 = vsyncpa [#allocation4], 0  ;;  %s371_s27 = smov [#allocation5]   ;;  %s21_s8 = sshll.u32 %s442_s0, 4  ;;  %s22_s8 = int_to_ptr.hbm [resolvable:$true] %s21_s8 }
   0x4   :  { %s33_s28 = sshll.u32 %s371_s27, 4  ;;  %s372_s9 = smov 128   ;;  %s34_s28 = int_to_ptr.vmem [resolvable:$true] %s33_s28 }
   0x5   :  { %s373_s10 = smov 8   ;;  %s374_s11 = smov [#allocation2]  }
   0x6   :  { %39 = dma.hbm_to_vmem [thread:$0]  %s32_s26, 2048, %s34_s28, [#allocation6], %s372_s9, %s372_s9, %s373_s10  }
   0x7   :  { %s23_s12 = sshll.u32 %s374_s11, 4  ;;  %s46_s15 = sshll.u32 %s445_s3, 4  ;;  %s24_s12 = int_to_ptr.vmem [resolvable:$true] %s23_s12  ;;  %s47_s15 = int_to_ptr.hbm [resolvable:$true] %s46_s15 }
   0x8   :  { %26 = dma.hbm_to_vmem [thread:$0]  %s22_s8, 128, %s24_s12, [#allocation3]  }
   0x9   :  { %s61_s17 = sshll.u32 %s447_s5, 4  ;;  %s375_s18 = smov [#allocation7]   ;;  %s62_s17 = int_to_ptr.hbm [resolvable:$true] %s61_s17 }
   0xa   :  { %s48_s19 = sshll.u32 %s375_s18, 4  ;;  %s376_s0 = smov [#allocation8]   ;;  %s49_s19 = int_to_ptr.vmem [resolvable:$true] %s48_s19 }
   0xb   :  { %54 = dma.hbm_to_vmem [thread:$0]  %s47_s15, 2048, %s49_s19, [#allocation6], %s372_s9, %s372_s9, %s373_s10  }
   0xc   :  { %s63_s20 = sshll.u32 %s376_s0, 4  ;;  %s64_s20 = int_to_ptr.vmem [resolvable:$true] %s63_s20 }
   0xd   :  { %69 = dma.hbm_to_vmem [thread:$0]  %s62_s17, 2048, %s64_s20, [#allocation9], %s372_s9, %s372_s9, %s373_s10  }
   0xe   :  { %363 = dma.done.wait [#allocation3], 128  }
   0xf   :  { %364 = vsyncadd [#allocation3], 4294967168 }
  0x10   :  { %365 = dma.done.wait [#allocation6], 4096  }
  0x11   :  { %366 = vsyncadd [#allocation6], 4294963200 }
  0x12   :  { %367 = dma.done.wait [#allocation9], 2048  }
  0x13   :  { %368 = vsyncadd [#allocation9], 4294965248  ;;  %v104_v0 = vld [vmem:[#allocation5 + $0x78] sm:$0xff]  ;;  %v103_v1 = vld [vmem:[#allocation5 + $0x70] sm:$0xff]  ;;  %s377_s24 = smov [#allocation10]   ;;  %s221_s28 = sshll.u32 %s449_s7, 4  ;;  %s222_s28 = int_to_ptr.hbm [resolvable:$true] %s221_s28 }
  0x14   :  { %109 = vmatpush.msra.mxu0 %v104_v0  ;;  %v102_v2 = vld [vmem:[#allocation5 + $0x68] sm:$0xff]  ;;  %v101_v3 = vld [vmem:[#allocation5 + $0x60] sm:$0xff]  ;;  %v145_v4 = vld [vmem:[#allocation7 + $0x78] sm:$0xff]  ;;  %s219_s25 = sshll.u32 %s377_s24, 4  ;;  %s220_s25 = int_to_ptr.vmem [resolvable:$true] %s219_s25 }
  0x15   :  { %v100_v5 = vld [vmem:[#allocation5 + $0x58] sm:$0xff]  ;;  %150 = vmatpush.msra.mxu1 %v145_v4  ;;  %v144_v6 = vld [vmem:[#allocation7 + $0x70] sm:$0xff]  ;;  %v143_v7 = vld [vmem:[#allocation7 + $0x68] sm:$0xff] }
  0x16   :  { %110 = vmatpush.msra.mxu0 %v103_v1  ;;  %v99_v8 = vld [vmem:[#allocation5 + $0x50] sm:$0xff]  ;;  %v142_v9 = vld [vmem:[#allocation7 + $0x60] sm:$0xff]  ;;  %v98_v10 = vld [vmem:[#allocation5 + $0x48] sm:$0xff] }
  0x17   :  { %151 = vmatpush.msra.mxu1 %v144_v6  ;;  %v141_v11 = vld [vmem:[#allocation7 + $0x58] sm:$0xff]  ;;  %v97_v12 = vld [vmem:[#allocation5 + $0x40] sm:$0xff]  ;;  %v140_v13 = vld [vmem:[#allocation7 + $0x50] sm:$0xff] }
  0x18   :  { %111 = vmatpush.msra.mxu0 %v102_v2  ;;  %v96_v14 = vld [vmem:[#allocation5 + $0x38] sm:$0xff]  ;;  %v139_v15 = vld [vmem:[#allocation7 + $0x48] sm:$0xff]  ;;  %v95_v16 = vld [vmem:[#allocation5 + $0x30] sm:$0xff] }
  0x19   :  { %152 = vmatpush.msra.mxu1 %v143_v7  ;;  %v138_v17 = vld [vmem:[#allocation7 + $0x40] sm:$0xff]  ;;  %v94_v18 = vld [vmem:[#allocation5 + $0x28] sm:$0xff]  ;;  %v137_v19 = vld [vmem:[#allocation7 + $0x38] sm:$0xff] }
  0x1a   :  { %112 = vmatpush.msra.mxu0 %v101_v3  ;;  %v93_v20 = vld [vmem:[#allocation5 + $0x20] sm:$0xff]  ;;  %v136_v21 = vld [vmem:[#allocation7 + $0x30] sm:$0xff]  ;;  %v92_v22 = vld [vmem:[#allocation5 + $0x18] sm:$0xff] }
  0x1b   :  { %153 = vmatpush.msra.mxu1 %v142_v9  ;;  %v135_v23 = vld [vmem:[#allocation7 + $0x28] sm:$0xff]  ;;  %v91_v24 = vld [vmem:[#allocation5 + $0x10] sm:$0xff]  ;;  %v134_v25 = vld [vmem:[#allocation7 + $0x20] sm:$0xff] }
  0x1c   :  { %113 = vmatpush.msra.mxu0 %v100_v5  ;;  %v90_v26 = vld [vmem:[#allocation5 + $0x8] sm:$0xff]  ;;  %v133_v27 = vld [vmem:[#allocation7 + $0x18] sm:$0xff]  ;;  %v89_v28 = vld [vmem:[#allocation5] sm:$0xff] }
  0x1d   :  { %154 = vmatpush.msra.mxu1 %v141_v11  ;;  %v88_v29 = vld [vmem:[#allocation2] sm:$0xff]  ;;  %v132_v30 = vld [vmem:[#allocation7 + $0x10] sm:$0xff]  ;;  %v131_v31 = vld [vmem:[#allocation7 + $0x8] sm:$0xff] }
  0x1e   :  { %114 = vmatpush.msra.mxu0 %v99_v8  ;;  %v130_v32 = vld [vmem:[#allocation7] sm:$0xff]  ;;  %v188_v33 = vld [vmem:[#allocation8 + $0x78] sm:$0xff]  ;;  %v187_v34 = vld [vmem:[#allocation8 + $0x70] sm:$0xff] }
  0x1f   :  { %155 = vmatpush.msra.mxu1 %v140_v13  ;;  %193 = vmatpush.msra.mxu2 %v188_v33  ;;  %v186_v35 = vld [vmem:[#allocation8 + $0x68] sm:$0xff]  ;;  %v185_v36 = vld [vmem:[#allocation8 + $0x60] sm:$0xff]  ;;  %v184_v37 = vld [vmem:[#allocation8 + $0x58] sm:$0xff] }
  0x20   :  { %115 = vmatpush.msra.mxu0 %v98_v10  ;;  %v183_v38 = vld [vmem:[#allocation8 + $0x50] sm:$0xff]  ;;  %v182_v39 = vld [vmem:[#allocation8 + $0x48] sm:$0xff]  ;;  %v181_v40 = vld [vmem:[#allocation8 + $0x40] sm:$0xff] }
  0x21   :  { %156 = vmatpush.msra.mxu1 %v139_v15  ;;  %194 = vmatpush.msra.mxu2 %v187_v34  ;;  %v180_v41 = vld [vmem:[#allocation8 + $0x38] sm:$0xff]  ;;  %v179_v42 = vld [vmem:[#allocation8 + $0x30] sm:$0xff]  ;;  %v178_v43 = vld [vmem:[#allocation8 + $0x28] sm:$0xff] }
  0x22   :  { %116 = vmatpush.msra.mxu0 %v97_v12  ;;  %v177_v44 = vld [vmem:[#allocation8 + $0x20] sm:$0xff]  ;;  %v176_v45 = vld [vmem:[#allocation8 + $0x18] sm:$0xff]  ;;  %v175_v50 = vld [vmem:[#allocation8 + $0x10] sm:$0xff] }
  0x23   :  { %157 = vmatpush.msra.mxu1 %v138_v17  ;;  %195 = vmatpush.msra.mxu2 %v186_v35  ;;  %v240_v46 = vld [vmem:[%s444_s2] ss:$0 sm:$0xff]  ;;  %v174_v51 = vld [vmem:[#allocation8 + $0x8] sm:$0xff]  ;;  %v173_v52 = vld [vmem:[#allocation8] sm:$0xff] }
  0x24   :  { %117 = vmatpush.msra.mxu0 %v96_v14  ;;  %v241_v53 = vld [vmem:[%s446_s4] ss:$0 sm:$0xff] }
  0x25   :  { %158 = vmatpush.msra.mxu1 %v137_v19  ;;  %196 = vmatpush.msra.mxu2 %v185_v36  ;;  %v242_v58 = vld [vmem:[%s448_s6] ss:$0 sm:$0xff] }
  0x26   :  { %118 = vmatpush.msra.mxu0 %v95_v16 }
  0x27   :  { %159 = vmatpush.msra.mxu1 %v136_v21  ;;  %197 = vmatpush.msra.mxu2 %v184_v37 }
  0x28   :  { %119 = vmatpush.msra.mxu0 %v94_v18 }
  0x29   :  { %160 = vmatpush.msra.mxu1 %v135_v23  ;;  %198 = vmatpush.msra.mxu2 %v183_v38 }
  0x2a   :  { %120 = vmatpush.msra.mxu0 %v93_v20 }
  0x2b   :  { %161 = vmatpush.msra.mxu1 %v134_v25  ;;  %199 = vmatpush.msra.mxu2 %v182_v39 }
  0x2c   :  { %121 = vmatpush.msra.mxu0 %v92_v22 }
  0x2d   :  { %162 = vmatpush.msra.mxu1 %v133_v27  ;;  %200 = vmatpush.msra.mxu2 %v181_v40 }
  0x2e   :  { %122 = vmatpush.msra.mxu0 %v91_v24 }
  0x2f   :  { %163 = vmatpush.msra.mxu1 %v132_v30  ;;  %201 = vmatpush.msra.mxu2 %v180_v41 }
  0x30   :  { %123 = vmatpush.msra.mxu0 %v90_v26 }
  0x31   :  { %164 = vmatpush.msra.mxu1 %v131_v31  ;;  %202 = vmatpush.msra.mxu2 %v179_v42 }
  0x32   :  { %124 = vmatpush.msra.mxu0 %v89_v28 }
  0x33   :  { %125 = vmatmul.f32.vlgmr.msra.gmra.mxu0 %v88_v29  ;;  %165 = vmatpush.msra.mxu1 %v130_v32 }
  0x34   :  { %203 = vmatpush.msra.mxu2 %v178_v43 }
  0x36   :  { %204 = vmatpush.msra.mxu2 %v177_v44 }
  0x38   :  { %205 = vmatpush.msra.mxu2 %v176_v45 }
  0x3a   :  { %206 = vmatpush.msra.mxu2 %v175_v50 }
  0x3c   :  { %207 = vmatpush.msra.mxu2 %v174_v51 }
  0x3e   :  { %208 = vmatpush.msra.mxu2 %v173_v52 }
  0xb0   :  { %v126_v47 = vpop.f32.mrf.mxu0 }
  0xb1   :  { %v127_v48 = vadd.f32 %v240_v46, %v126_v47 }
  0xb3   :  { %v129_v49 = vmax.f32 %v127_v48, 0.0 }
  0xb5   :  { %166 = vmatmul.f32.vlgmr.msra.gmra.mxu1 %v129_v49 }
 0x132   :  { %v167_v54 = vpop.f32.mrf.mxu1 }
 0x133   :  { %v168_v55 = vadd.f32 %v241_v53, %v167_v54 }
 0x135   :  { %vm170_vm0 = vcmp.gt.f32.partialorder %v168_v55, 0.0  ;;  %v171_v56 = vmul.f32 0.01, %v168_v55 }
 0x137   :  { %v172_v57 = vsel %vm170_vm0, %v168_v55, %v171_v56 }
 0x138   :  { %209 = vmatmul.f32.vlgmr.msra.gmra.mxu2 %v172_v57 }
 0x1bb   :  { %v210_v59 = vpop.f32.mrf.mxu2 }
 0x1bc   :  { %v211_v60 = vadd.f32 %v242_v58, %v210_v59 }
 0x1be   :  { %213 = vst [vmem:[#allocation10] sm:$0xff] %v211_v60 }
 0x1bf   :  { %224 = dma.vmem_to_hbm [thread:$0]  %s220_s25, 128, %s222_s28, [#allocation4]  }
 0x1c0   :  { %369 = dma.done.wait [#allocation4], 128  }
 0x1c1   :  { %370 = vsyncadd [#allocation4], 4294967168 }
 0x1c2   :  { %229 = vsyncpa [#allocation3], 1 }
 0x1c3   :  { %230 = vsyncpa [#allocation6], 1 }
 0x1c4   :  { %231 = vsyncpa [#allocation9], 1 }
 0x1c5   :  { %232 = vsyncpa [#allocation4], 1 }

</bundles_post_ra>
